<compile_context>
chip_gen: v7x
topology: tpu7x:2x2x1
jax: 0.10.0
libtpu: 0.0.40
codegen_flags: <defaults>
</compile_context>

<pallas_src>
import functools

import jax
import jax.numpy as jnp
from jax import lax
from jax.experimental import pallas as pl
from jax.experimental.pallas import tpu as pltpu


# ---------------------------------------------------------------------------
# Per-head attention compute (shared by both kernel variants)
# ---------------------------------------------------------------------------

def _head_attention(x_ref, wqkv_ref, scale):
    """Single-head attention for the current grid step.

    x_ref   : (1, n, dim) VMEM block (full sequence for one batch element)
    wqkv_ref: (3, 1, dim_head, dim) VMEM block (this head's q/k/v weights)
    Returns the (n, dim_head) head output in f32.
    """
    xb = x_ref[0].astype(jnp.bfloat16)                     # (n, dim)
    wq = wqkv_ref[0, 0].astype(jnp.bfloat16)               # (dim_head, dim)
    wk = wqkv_ref[1, 0].astype(jnp.bfloat16)
    wv = wqkv_ref[2, 0].astype(jnp.bfloat16)

    # Projections: contract the `dim` axes of both operands (PyTorch (out,in)
    # weight layout -> no in-kernel transpose).  bf16 in, f32 accumulate.
    dn_nt = (((1,), (1,)), ((), ()))
    q = lax.dot_general(xb, wq, dn_nt, preferred_element_type=jnp.float32)
    k = lax.dot_general(xb, wk, dn_nt, preferred_element_type=jnp.float32)
    v = lax.dot_general(xb, wv, dn_nt, preferred_element_type=jnp.float32)

    # Fold the softmax scale into q (n*dim_head multiplies instead of n*n).
    qs = (q * scale).astype(jnp.bfloat16)
    dots = lax.dot_general(qs, k.astype(jnp.bfloat16), dn_nt,
                           preferred_element_type=jnp.float32)   # (n, n)

    # Softmax: max / exp / sum kept in f32 for stability (and v5e support).
    m = jnp.max(dots, axis=-1, keepdims=True)
    p = jnp.exp(dots - m)
    denom = jnp.sum(p, axis=-1, keepdims=True)
    attn = (p * pl.reciprocal(denom, approx=True)).astype(jnp.bfloat16)

    dn_nn = (((1,), (0,)), ((), ()))
    return lax.dot_general(attn, v.astype(jnp.bfloat16), dn_nn,
                           preferred_element_type=jnp.float32)   # (n, dim_head)


# ---------------------------------------------------------------------------
# Fused kernels
# ---------------------------------------------------------------------------

def _attention_proj_kernel(x_ref, wqkv_ref, wout_ref, bout_ref, o_ref, acc_ref,
                           *, scale):
    """One (batch, head) grid step with the to_out projection fused in."""
    hi = pl.program_id(1)

    @pl.when(hi == 0)
    def _():
        acc_ref[...] = jnp.zeros_like(acc_ref)

    out_h = _head_attention(x_ref, wqkv_ref, scale)          # (n, dim_head) f32

    # Fused to_out: accumulate this head's contribution out_h @ W_out_h^T.
    wo = wout_ref[0].astype(jnp.bfloat16)                    # (dim_head, dim)
    acc_ref[...] += lax.dot_general(
        out_h.astype(jnp.bfloat16), wo, (((1,), (0,)), ((), ())),
        preferred_element_type=jnp.float32)

    @pl.when(hi == pl.num_programs(1) - 1)
    def _():
        # Single lane-dense (n, dim) store per batch element.
        o_ref[0] = (acc_ref[...] + bout_ref[...].astype(jnp.float32)
                    ).astype(o_ref.dtype)


def _attention_noproj_kernel(x_ref, wqkv_ref, o_ref, *, scale):
    # project_out is False only when heads == 1 and dim_head == dim, so this
    # single head's output IS the module output (to_out = nn.Identity()).
    o_ref[0] = _head_attention(x_ref, wqkv_ref, scale).astype(o_ref.dtype)


# ---------------------------------------------------------------------------
# Module wrapper
# ---------------------------------------------------------------------------

def make_attention_params(key, dim, heads, dim_head, dtype=jnp.float32):
    inner_dim = dim_head * heads
    k1, k2, k3 = jax.random.split(key, 3)
    return {
        # PyTorch nn.Linear weight layout: (out_features, in_features)
        "w_qkv": jax.random.normal(k1, (inner_dim * 3, dim), dtype) * 0.02,
        "w_out": jax.random.normal(k2, (dim, inner_dim), dtype) * 0.02,
        "b_out": jax.random.normal(k3, (dim,), dtype) * 0.02,
    }


def attention_forward(params, x, heads, dim_head):
    """Forward pass of the lucidrains `Attention` module (eval mode)."""
    b, n, dim = x.shape
    inner_dim = heads * dim_head
    scale = dim_head ** (-0.5)
    project_out = not (heads == 1 and dim_head == dim)

    # (3*inner, dim) -> (3, heads, dim_head, dim): free view of the fused
    # PyTorch to_qkv weight; the kernel takes tile-aligned per-head slabs.
    w_qkv = params["w_qkv"].reshape(3, heads, dim_head, dim)

    x_spec = pl.BlockSpec((1, n, dim), lambda bi, hi: (bi, 0, 0))
    wqkv_spec = pl.BlockSpec((3, 1, dim_head, dim), lambda bi, hi: (0, hi, 0, 0))

    itemsize = jnp.dtype(x.dtype).itemsize

    if project_out:
        # One-time weight-layout prep (parameter side, not per-token):
        # (dim, inner) -> (heads, dim_head, dim) so the kernel contracts each
        # head's slab without lane-offset slices.
        w_out_t = jnp.transpose(params["w_out"]).reshape(heads, dim_head, dim)
        b_out = params["b_out"].reshape(1, dim)
        out_dim = dim

        kernel = functools.partial(_attention_proj_kernel, scale=scale)
        in_specs = [
            x_spec,
            wqkv_spec,
            pl.BlockSpec((1, dim_head, dim), lambda bi, hi: (hi, 0, 0)),
            pl.BlockSpec((1, dim), lambda bi, hi: (0, 0)),
        ]
        args = (x, w_qkv, w_out_t, b_out)
        scratch = [pltpu.VMEM((n, out_dim), jnp.float32)]
        block_bytes = itemsize * (n * dim + 4 * dim_head * dim + dim
                                  + n * out_dim) + 4 * n * out_dim
    else:
        out_dim = inner_dim                      # == dim (heads == 1)
        kernel = functools.partial(_attention_noproj_kernel, scale=scale)
        in_specs = [x_spec, wqkv_spec]
        args = (x, w_qkv)
        scratch = []
        block_bytes = itemsize * (n * dim + 3 * dim_head * dim + n * out_dim)

    # Explicit scoped-VMEM budget: double-buffered blocks + softmax/score
    # temporaries + slack, clamped to stay under v7x's 64 MiB physical VMEM.
    vmem_limit = int(min(max(4 * block_bytes + 4 * n * n + (16 << 20),
                             32 << 20),
                         48 << 20))

    out = pl.pallas_call(
        kernel,
        out_shape=jax.ShapeDtypeStruct((b, n, out_dim), x.dtype),
        grid_spec=pltpu.PrefetchScalarGridSpec(
            num_scalar_prefetch=0,
            grid=(b, heads),
            in_specs=in_specs,
            out_specs=pl.BlockSpec((1, n, out_dim), lambda bi, hi: (bi, 0, 0)),
            scratch_shapes=scratch),
        compiler_params=pltpu.CompilerParams(
            dimension_semantics=("parallel", "arbitrary"),
            vmem_limit_bytes=vmem_limit),
    )(*args)
    # TODO(synk): nn.Dropout(p=0.0) in eval mode is the identity; a training
    # path would need pltpu.prng_seed + prng_random_bits masking.
    return out


# ---------------------------------------------------------------------------
# Pure-JAX reference for sanity check
# ---------------------------------------------------------------------------

def attention_ref(params, x, heads, dim_head):
    b, n, dim = x.shape
    inner_dim = heads * dim_head
    scale = dim_head ** (-0.5)
    project_out = not (heads == 1 and dim_head == dim)
    qkv = jnp.einsum("bnk,ok->bno", x, params["w_qkv"])
    q, k, v = jnp.split(qkv, 3, axis=-1)

    def sh(t):
        return jnp.transpose(t.reshape(b, n, heads, dim_head), (0, 2, 1, 3))

    q, k, v = sh(q), sh(k), sh(v)
    dots = jnp.einsum("bhid,bhjd->bhij", q, k) * scale
    attn = jax.nn.softmax(dots, axis=-1)
    out = jnp.einsum("bhij,bhjd->bhid", attn, v)
    out = jnp.transpose(out, (0, 2, 1, 3)).reshape(b, n, inner_dim)
    if project_out:
        out = jnp.einsum("bno,do->bnd", out, params["w_out"]) + params["b_out"]
    return out


# ---------------------------------------------------------------------------
# Main
# ---------------------------------------------------------------------------

if __name__ == "__main__":
    dim, heads, dim_head = 32, 4, 16
    batch, seq = 2, 8

    key = jax.random.PRNGKey(0)
    kx, kp = jax.random.split(key)
    x = jax.random.normal(kx, (batch, seq, dim), jnp.float32)
    params = make_attention_params(kp, dim, heads, dim_head)

    out = attention_forward(params, x, heads, dim_head)
    out = jax.block_until_ready(out)

    ref = attention_ref(params, x, heads, dim_head)
    assert out.shape == (batch, seq, dim)
    # Tolerance covers bf16 MXU operands + the EUP approximate reciprocal.
    assert jnp.allclose(out, ref, atol=2e-2, rtol=2e-2), "mismatch vs reference"

    print("KERNEL_OK")
</pallas_src>

<mosaic_0001>
module attributes {stable_mosaic.version = 11 : i64} {
  func.func @_attention_proj_kernel(%arg0: i32, %arg1: i32, %arg2: memref<1x8x32xf32, #tpu.memory_space<vmem>>, %arg3: memref<3x1x16x32xf32, #tpu.memory_space<vmem>>, %arg4: memref<1x16x32xf32, #tpu.memory_space<vmem>>, %arg5: memref<1x32xf32, #tpu.memory_space<vmem>>, %arg6: memref<1x8x32xf32, #tpu.memory_space<vmem>>, %arg7: memref<8x32xf32, #tpu.memory_space<vmem>>) attributes {dimension_semantics = [#tpu.dimension_semantics<parallel>, #tpu.dimension_semantics<arbitrary>], iteration_bounds = array<i64: 2, 4>, scalar_prefetch = 0 : i64, scratch_operands = 1 : i64, tpu.core_type = #tpu.core_type<tc>, window_params = [{transform_indices = @transform_0, window_bounds = array<i64: 1, 8, 32>}, {transform_indices = @transform_1, window_bounds = array<i64: 3, 1, 16, 32>}, {transform_indices = @transform_2, window_bounds = array<i64: 1, 16, 32>}, {pipeline_mode = #tpu.pipeline_mode<synchronous>, transform_indices = @transform_3, window_bounds = array<i64: 1, 32>}, {transform_indices = @transform_4, window_bounds = array<i64: 1, 8, 32>}]} {
    %c0_i32 = arith.constant 0 : i32
    %0 = arith.cmpi eq, %arg1, %c0_i32 : i32
    %1 = arith.extui %0 : i1 to i32
    %c0_i32_0 = arith.constant 0 : i32
    %2 = arith.cmpi ne, %1, %c0_i32_0 : i32
    scf.if %2 {
      %cst_29 = arith.constant 0.000000e+00 : f32
      %47 = vector.broadcast %cst_29 : f32 to vector<8x32xf32>
      %c0_30 = arith.constant 0 : index
      %c0_31 = arith.constant 0 : index
      %48 = vector.load %arg7[%c0_30, %c0_31] : memref<8x32xf32, #tpu.memory_space<vmem>>, vector<8x32xf32>
      tpu.vector_store %arg7[%c0_30, %c0_31], %47 {strides = array<i32>} : memref<8x32xf32, #tpu.memory_space<vmem>>, vector<8x32xf32>,
    } else {
    }
    %c0 = arith.constant 0 : index
    %c0_1 = arith.constant 0 : index
    %c0_2 = arith.constant 0 : index
    %3 = vector.load %arg2[%c0, %c0_1, %c0_2] : memref<1x8x32xf32, #tpu.memory_space<vmem>>, vector<1x8x32xf32>
    %4 = vector.shape_cast %3 : vector<1x8x32xf32> to vector<8x32xf32>
    %5 = arith.truncf %4 : vector<8x32xf32> to vector<8x32xbf16>
    %c0_3 = arith.constant 0 : index
    %c0_4 = arith.constant 0 : index
    %c0_5 = arith.constant 0 : index
    %c0_6 = arith.constant 0 : index
    %6 = vector.load %arg3[%c0_3, %c0_4, %c0_5, %c0_6] : memref<3x1x16x32xf32, #tpu.memory_space<vmem>>, vector<1x1x16x32xf32>
    %7 = vector.shape_cast %6 : vector<1x1x16x32xf32> to vector<16x32xf32>
    %8 = arith.truncf %7 : vector<16x32xf32> to vector<16x32xbf16>
    %c1 = arith.constant 1 : index
    %c0_7 = arith.constant 0 : index
    %c0_8 = arith.constant 0 : index
    %c0_9 = arith.constant 0 : index
    %9 = vector.load %arg3[%c1, %c0_7, %c0_8, %c0_9] : memref<3x1x16x32xf32, #tpu.memory_space<vmem>>, vector<1x1x16x32xf32>
    %10 = vector.shape_cast %9 : vector<1x1x16x32xf32> to vector<16x32xf32>
    %11 = arith.truncf %10 : vector<16x32xf32> to vector<16x32xbf16>
    %c2 = arith.constant 2 : index
    %c0_10 = arith.constant 0 : index
    %c0_11 = arith.constant 0 : index
    %c0_12 = arith.constant 0 : index
    %12 = vector.load %arg3[%c2, %c0_10, %c0_11, %c0_12] : memref<3x1x16x32xf32, #tpu.memory_space<vmem>>, vector<1x1x16x32xf32>
    %13 = vector.shape_cast %12 : vector<1x1x16x32xf32> to vector<16x32xf32>
    %14 = arith.truncf %13 : vector<16x32xf32> to vector<16x32xbf16>
    %cst = arith.constant dense<0.000000e+00> : vector<8x16xf32>
    %15 = tpu.matmul %5, %8, %cst {dimension_numbers = #tpu.dot_dimension_numbers<[1], [1], [0], [0], [0, 0, 1, 0], [], []>} : vector<8x32xbf16>, vector<16x32xbf16>, vector<8x16xf32> -> vector<8x16xf32>
    %cst_13 = arith.constant dense<0.000000e+00> : vector<8x16xf32>
    %16 = tpu.matmul %5, %11, %cst_13 {dimension_numbers = #tpu.dot_dimension_numbers<[1], [1], [0], [0], [0, 0, 1, 0], [], []>} : vector<8x32xbf16>, vector<16x32xbf16>, vector<8x16xf32> -> vector<8x16xf32>
    %cst_14 = arith.constant dense<0.000000e+00> : vector<8x16xf32>
    %17 = tpu.matmul %5, %14, %cst_14 {dimension_numbers = #tpu.dot_dimension_numbers<[1], [1], [0], [0], [0, 0, 1, 0], [], []>} : vector<8x32xbf16>, vector<16x32xbf16>, vector<8x16xf32> -> vector<8x16xf32>
    %cst_15 = arith.constant 2.500000e-01 : f32
    %18 = vector.broadcast %cst_15 : f32 to vector<8x16xf32>
    %19 = arith.mulf %15, %18 : vector<8x16xf32>
    %20 = arith.truncf %19 : vector<8x16xf32> to vector<8x16xbf16>
    %21 = arith.truncf %16 : vector<8x16xf32> to vector<8x16xbf16>
    %cst_16 = arith.constant dense<0.000000e+00> : vector<8x8xf32>
    %22 = tpu.matmul %20, %21, %cst_16 {dimension_numbers = #tpu.dot_dimension_numbers<[1], [1], [0], [0], [0, 0, 1, 0], [], []>} : vector<8x16xbf16>, vector<8x16xbf16>, vector<8x8xf32> -> vector<8x8xf32>
    %cst_17 = arith.constant dense<0xFF800000> : vector<8xf32>
    %23 = vector.multi_reduction <maximumf>, %22, %cst_17 [1] : vector<8x8xf32> to vector<8xf32>
    %24 = vector.shape_cast %23 : vector<8xf32> to vector<8x1xf32>
    %25 = vector.broadcast %24 : vector<8x1xf32> to vector<8x8xf32>
    %26 = arith.subf %22, %25 : vector<8x8xf32>
    %27 = math.exp %26 : vector<8x8xf32>
    %cst_18 = arith.constant dense<0.000000e+00> : vector<8xf32>
    %28 = vector.multi_reduction <add>, %27, %cst_18 [1] : vector<8x8xf32> to vector<8xf32>
    %29 = vector.shape_cast %28 : vector<8xf32> to vector<8x1xf32>
    %30 = tpu.reciprocal %29 {approx = true} : vector<8x1xf32> -> vector<8x1xf32>
    %31 = vector.broadcast %30 : vector<8x1xf32> to vector<8x8xf32>
    %32 = arith.mulf %27, %31 : vector<8x8xf32>
    %33 = arith.truncf %32 : vector<8x8xf32> to vector<8x8xbf16>
    %34 = arith.truncf %17 : vector<8x16xf32> to vector<8x16xbf16>
    %cst_19 = arith.constant dense<0.000000e+00> : vector<8x16xf32>
    %35 = tpu.matmul %33, %34, %cst_19 {dimension_numbers = #tpu.dot_dimension_numbers<[1], [0], [0], [1], [0, 0, 1, 1], [], []>} : vector<8x8xbf16>, vector<8x16xbf16>, vector<8x16xf32> -> vector<8x16xf32>
    %c0_20 = arith.constant 0 : index
    %c0_21 = arith.constant 0 : index
    %c0_22 = arith.constant 0 : index
    %36 = vector.load %arg4[%c0_20, %c0_21, %c0_22] : memref<1x16x32xf32, #tpu.memory_space<vmem>>, vector<1x16x32xf32>
    %37 = vector.shape_cast %36 : vector<1x16x32xf32> to vector<16x32xf32>
    %38 = arith.truncf %37 : vector<16x32xf32> to vector<16x32xbf16>
    %c0_23 = arith.constant 0 : index
    %c0_24 = arith.constant 0 : index
    %39 = vector.load %arg7[%c0_23, %c0_24] : memref<8x32xf32, #tpu.memory_space<vmem>>, vector<8x32xf32>
    %40 = arith.truncf %35 : vector<8x16xf32> to vector<8x16xbf16>
    %cst_25 = arith.constant dense<0.000000e+00> : vector<8x32xf32>
    %41 = tpu.matmul %40, %38, %cst_25 {dimension_numbers = #tpu.dot_dimension_numbers<[1], [0], [0], [1], [0, 0, 1, 1], [], []>} : vector<8x16xbf16>, vector<16x32xbf16>, vector<8x32xf32> -> vector<8x32xf32>
    %42 = arith.addf %39, %41 : vector<8x32xf32>
    %c0_26 = arith.constant 0 : index
    %c0_27 = arith.constant 0 : index
    %43 = vector.load %arg7[%c0_26, %c0_27] : memref<8x32xf32, #tpu.memory_space<vmem>>, vector<8x32xf32>
    tpu.vector_store %arg7[%c0_26, %c0_27], %42 {strides = array<i32>} : memref<8x32xf32, #tpu.memory_space<vmem>>, vector<8x32xf32>,
    %c3_i32 = arith.constant 3 : i32
    %44 = arith.cmpi eq, %arg1, %c3_i32 : i32
    %45 = arith.extui %44 : i1 to i32
    %c0_i32_28 = arith.constant 0 : i32
    %46 = arith.cmpi ne, %45, %c0_i32_28 : i32
    scf.if %46 {
      %c0_29 = arith.constant 0 : index
      %c0_30 = arith.constant 0 : index
      %47 = vector.load %arg7[%c0_29, %c0_30] : memref<8x32xf32, #tpu.memory_space<vmem>>, vector<8x32xf32>
      %c0_31 = arith.constant 0 : index
      %c0_32 = arith.constant 0 : index
      %48 = vector.load %arg5[%c0_31, %c0_32] : memref<1x32xf32, #tpu.memory_space<vmem>>, vector<1x32xf32>
      %49 = vector.broadcast %48 : vector<1x32xf32> to vector<8x32xf32>
      %50 = arith.addf %47, %49 : vector<8x32xf32>
      %c0_33 = arith.constant 0 : index
      %c0_34 = arith.constant 0 : index
      %c0_35 = arith.constant 0 : index
      %51 = vector.load %arg6[%c0_33, %c0_34, %c0_35] : memref<1x8x32xf32, #tpu.memory_space<vmem>>, vector<1x8x32xf32>
      %52 = vector.shape_cast %51 : vector<1x8x32xf32> to vector<8x32xf32>
      %53 = vector.shape_cast %50 : vector<8x32xf32> to vector<1x8x32xf32>
      tpu.vector_store %arg6[%c0_33, %c0_34, %c0_35], %53 {strides = array<i32>} : memref<1x8x32xf32, #tpu.memory_space<vmem>>, vector<1x8x32xf32>,
    } else {
    }
    return
  }
  func.func @transform_0(%arg0: i32, %arg1: i32) -> (i32, i32, i32) {
    %c0_i32 = arith.constant 0 : i32
    %c0_i32_0 = arith.constant 0 : i32
    %c0_i32_1 = arith.constant 0 : i32
    return %arg0, %c0_i32, %c0_i32_0 : i32, i32, i32
  }
  func.func @transform_1(%arg0: i32, %arg1: i32) -> (i32, i32, i32, i32) {
    %c0_i32 = arith.constant 0 : i32
    %c0_i32_0 = arith.constant 0 : i32
    %c0_i32_1 = arith.constant 0 : i32
    %c0_i32_2 = arith.constant 0 : i32
    return %c0_i32, %arg1, %c0_i32_0, %c0_i32_1 : i32, i32, i32, i32
  }
  func.func @transform_2(%arg0: i32, %arg1: i32) -> (i32, i32, i32) {
    %c0_i32 = arith.constant 0 : i32
    %c0_i32_0 = arith.constant 0 : i32
    %c0_i32_1 = arith.constant 0 : i32
    return %arg1, %c0_i32, %c0_i32_0 : i32, i32, i32
  }
  func.func @transform_3(%arg0: i32, %arg1: i32) -> (i32, i32) {
    %c0_i32 = arith.constant 0 : i32
    %c0_i32_0 = arith.constant 0 : i32
    %c0_i32_1 = arith.constant 0 : i32
    return %c0_i32, %c0_i32_0 : i32, i32
  }
  func.func @transform_4(%arg0: i32, %arg1: i32) -> (i32, i32, i32) {
    %c0_i32 = arith.constant 0 : i32
    %c0_i32_0 = arith.constant 0 : i32
    %c0_i32_1 = arith.constant 0 : i32
    return %arg0, %c0_i32, %c0_i32_0 : i32, i32, i32
  }
}

</mosaic_0001>

<bundles_post_ra>
// kernel: tpu_custom_call.1
= control target key start
LH: loop header
LB: loop body
LE: loop exit
PB: predicated region body
PF: predicated region fallthrough
CT: control target
= control target key end

     0   :  { %s1562_s0 = inlined_call_operand.hbm [shape: f32[2,8,32], index: 0, kind: input, shape index: {}]   ;;  %s1563_s1 = inlined_call_operand.hbm [shape: f32[3,4,16,32], index: 1, kind: input, shape index: {}]   ;;  %s1564_s2 = inlined_call_operand.hbm [shape: f32[4,16,32], index: 2, kind: input, shape index: {}]   ;;  %s1565_s3 = inlined_call_operand.vmem [shape: f32[1,32], index: 3, kind: input, shape index: {}]   ;;  %s1566_s4 = inlined_call_operand.hbm [shape: f32[2,8,32], index: 4, kind: output, shape index: {}]  }
   0x1   :  { %1578 = sst [smem:[#allocation24_spill]] %s1562_s0 }
   0x2   :  { %1579 = sst [smem:[#allocation25_spill]] %s1563_s1 }
   0x3   :  { %9 = vsyncpa [#allocation4], 0 }
   0x4   :  { %11 = vsyncpa [#allocation4 + $0x1], 0 }
   0x5   :  { %12 = vsyncpa [#allocation7], 0 }
   0x6   :  { %14 = vsyncpa [#allocation7 + $0x1], 0 }
   0x7   :  { %15 = vsyncpa [#allocation5], 0 }
   0x8   :  { %17 = vsyncpa [#allocation5 + $0x1], 0  ;;  %s1225_s15 = smov 0   ;;  %s1227_s16 = smov 0  }
   0x9   :  { %s1229_s17 = smov 0   ;;  %s1231_s18 = smov 0  }
   0xa   :  { %s1233_s19 = smov 0   ;;  %s1235_s20 = smov 0  }
   0xb   :  { %s1237_s21 = smov 0   ;;  %s1239_s22 = smov 0  }
   0xc   :  { %s1241_s23 = smov 0   ;;  %s1243_s24 = smov 0  }
   0xd   :  { %s1245_s25 = smov 0  }
   0xe LB: > { %1580 = sst [smem:[#allocation16_spill]] %s1156_s18  ;;  %s1281_s26 = sadd.s32 4294967295, %s1184_s25   ;;  %s1184_s25 = sphi %s1245_s25, %s23_s25   ;;  %s1180_s24 = sphi %s1243_s24, %s1609_s24   ;;  %s1176_s23 = sphi %s1241_s23, %s1616_s23   ;;  %s1172_s22 = sphi %s1239_s22, %s1607_s22   ;;  %s1168_s21 = sphi %s1237_s21, %s1615_s21   ;;  %s1164_s20 = sphi %s1235_s20, %s1606_s20   ;;  %s1160_s19 = sphi %s1233_s19, %s1614_s19   ;;  %s1156_s18 = sphi %s1231_s18, %s1613_s18   ;;  %s1152_s17 = sphi %s1229_s17, %s1612_s17   ;;  %s1148_s16 = sphi %s1227_s16, %s1611_s16   ;;  %s1144_s15 = sphi %s1225_s15, %s1610_s15  }
   0xf   : > { %1581 = sst [smem:[#allocation17_spill]] %s1164_s20  ;;  %s794_s27 = sadd.s32 4294967294, %s1184_s25  }
  0x10   : > { %1582 = sst [smem:[#allocation18_spill]] %s1180_s24  ;;  %s32_s28 = sadd.s32 1, %s1176_s23 }
  0x11   : > { %s35_s29 = sadd.s32 1, %s1180_s24  ;;  %p33_p0 = scmp.ge.s32.totalorder %s32_s28, 4 }
  0x12   : > { %s42_s30 = sadd.s32 1, %s1164_s20  ;;  %p49_p1 = scmp.ne.s32.totalorder %s1164_s20, %s1160_s19 }
  0x13   : > { %p50_p2 = scmp.eq.s32.totalorder %s1184_s25, 0  ;;  %s1618_s28 = smov (%p33_p0, %s32_s28), 0 }
  0x14   : > { %1583 = sst [smem:[#allocation19_spill]] %s1618_s28  ;;  %s1620_s29 = smov (!%p33_p0, %s35_s29), %s1180_s24 }
  0x15   : > { %p1298_p3 = por %p50_p2, %p49_p1  ;;  %p1567_p4 = scmp.ne.s32.totalorder %s1160_s19, %s1156_s18 }
  0x16   : > { %p37_p5 = scmp.ge.s32.totalorder %s1620_s29, 2  ;;  %p56_p6 = scmp.eq.s32.totalorder %s1281_s26, 0 }
  0x17   : > { %s65_s6 = ssub.s32 %s1176_s23, %s1618_s28  ;;  %s68_s7 = sadd.s32 1, %s1152_s17 }
  0x18   : > { %s1622_s29 = smov (%p37_p5, %s1620_s29), 0  ;;  %p1315_p7 = por %p56_p6, %p1567_p4 }
  0x19   : > { %1585 = sst [smem:[#allocation20_spill]] %s1622_s29  ;;  %p66_p8 = scmp.eq.s32.totalorder %s65_s6, 0 }
  0x1a   : > { %s1586_s8 = scalar_select %p1315_p7, 1, 0 }
  0x1b   : > { %s39_s9 = ssub.s32 %s1180_s24, %s1622_s29  ;;  %p75_p9 = scmp.ne.s32.totalorder %s1152_s17, %s1148_s16 }
  0x1c   : > { %p40_p10 = scmp.eq.s32.totalorder %s39_s9, 0  ;;  %p81_p11 = scmp.ne.s32.totalorder %s1148_s16, %s1144_s15 }
  0x1d   : > { %s1326_s10 = scalar_select %p66_p8, %s1152_s17, %s68_s7  }
  0x1e   : > { %s1329_s11 = scalar_select %p40_p10, %s1164_s20, %s42_s30  }
  0x1f   : > { %1587 = sst [smem:[#allocation21_spill]] %s1326_s10  ;;  %p1333_p12 = por %p75_p9, %p50_p2 }
  0x20   : > { %1588 = sst [smem:[#allocation22_spill]] %s1329_s11  ;;  %p1339_p13 = por %p81_p11, %p56_p6 }
  0x21   : > { %s1589_s12 = scalar_select %p1333_p12, 1, 0 }
  0x22   : > { %s1590_s13 = scalar_select %p1339_p13, 1, 0 }
  0x23   : > { %p152_p0 = scmp.eq.s32.totalorder %s1281_s26, 7  ;;  %p158_p5 = scmp.eq.s32.totalorder %s794_s27, 7 }
  0x24   : > { %p1592_p8 = scmp.ne.s32.totalorder %s1160_s19, %s1156_s18  ;;  %p796_p2 = scmp.ge.s32.totalorder %s1184_s25, 8 }
  0x25   : > { %p1347_p4 = por %p152_p0, %p49_p1  ;;  %s181_s30 = sand.u32 (!%p796_p2), 1, %s1164_s20  }
  0x26   : > { %p1354_p10 = por %p158_p5, %p1592_p8  ;;  %177 = sbr.rel (%p796_p2) target bundleno = 109 (0x6d), region = 20 }
  0x27   : > { %s1591_s14 = scalar_select %p1347_p4, 1, 0 }
  0x28   : > { %s1593_s15 = scalar_select %p1354_p10, 1, 0 }
  0x29   : > { %s798_s6 = sshll.u32 (!%p796_p2), %s1180_s24, 7  ;;  %s797_s7 = sshll.u32 (!%p796_p2), %s181_s30, 3 }
  0x2a   : > { %1594 = sst [smem:[#allocation23_spill]] %s1593_s15  ;;  %s1595_s0 = sld [smem:[#allocation24_spill]] (!%p796_p2) }
  0x2b   : > { %s185_s28 = scalar_lea.vmem (!%p796_p2), [#allocation3], %s797_s7  ;;  %s182_s10 = scalar_lea.sflag (!%p796_p2), [#allocation4], %s181_s30 }
  0x2c   : > { %s192_s11 = sshll.u32 (!%p796_p2), %s185_s28, 4  ;;  %s193_s11 = int_to_ptr.vmem [resolvable:$true] %s192_s11 }
  0x30   : > { %s1364_s29 = scalar_lea.hbm %s1595_s0, %s798_s6  ;;  %s1006_s18 = scalar_lea.hbm %s1595_s0, 256 }
  0x31   : > { %s1002_s15 = scalar_lea.hbm %s1364_s29, 128  ;;  %p1007_p11 = scmp.lt.u32.totalorder %s1364_s29, %s1595_s0 }
  0x32   : > { %p1003_p1 = scmp.ne.s32.totalorder %s1364_s29, %s1002_s15  ;;  %p1008_p0 = scmp.lt.u32.totalorder %s1006_s18, %s1002_s15 }
  0x33   : > { %p1010_p8 = scmp.lt.u32.totalorder %s1002_s15, %s1364_s29 }
  0x34   : > { %p1004_p6 = pnand %p1003_p1, %p1298_p3  ;;  %p1009_p5 = por %p1008_p0, %p1007_p11 }
  0x36   : > { %p1005_p9 = pneg %p1004_p6  ;;  %p1011_p2 = por %p1010_p8, %p1009_p5 }
  0x38   : > { %p1012_p10 = pnand %p1011_p2, %p1005_p9 }
  0x3a   : > { %1015 = shalt.err (!%p1012_p10)
}
  0x3b   : > { %s1016_s28 = scalar_lea.vmem %s193_s11, 128  ;;  %s1186_s30 = smov [#allocation3]  }
  0x3c   : > { %p1017_p4 = scmp.ne.s32.totalorder %s193_s11, %s1016_s28  ;;  %s1020_s7 = sshll.u32 %s1186_s30, 4  ;;  %s1021_s7 = int_to_ptr.vmem [resolvable:$false] %s1020_s7 }
  0x3d   : > { %s1022_s20 = scalar_lea.vmem %s1021_s7, 256  ;;  %p1023_p13 = scmp.lt.s32.totalorder %s193_s11, %s1021_s7 }
  0x3e   : > { %p1018_p1 = pnand %p1017_p4, %p1298_p3  ;;  %p1024_p7 = scmp.lt.s32.totalorder %s1022_s20, %s1016_s28 }
  0x40   : > { %p1019_p6 = pneg %p1018_p1  ;;  %p1025_p12 = por %p1024_p7, %p1023_p13 }
  0x42   : > { %p1026_p0 = pnand %p1025_p12, %p1019_p6 }
  0x44   : > { %1029 = shalt.err (!%p1026_p0)
}
  0x45   : > { %879 = dma.hbm_to_vmem [thread:$0]  (%p1298_p3), %s1364_s29, 128, %s193_s11, %s182_s10  }
  0x46   : > { %s199_s18 = sand.u32 1, %s1184_s25   ;;  %s201_s24 = sand.u32 1, %s1152_s17  }
  0x47   : > { %s877_s15 = smul.u32 48, %s201_s24  ;;  %s827_s9 = sshll.u32 %s1176_s23, 8 }
  0x48   : > { %p1596_p4 = scmp.ne.s32.totalorder %s1589_s12, 0  ;;  %s1597_s1 = sld [smem:[#allocation25_spill]] }
  0x49   : > { %s1187_s29 = smov 1024   ;;  %s203_s11 = scalar_lea.vmem [#allocation6], %s877_s15 }
  0x4a   : > { %s880_s27 = scalar_select %p1596_p4, [#allocation0], [#allocation12] }
  0x4b   : > { %881 = sst [smem:[#allocation11]] (%p1596_p4), %s1187_s29  ;;  %s222_s30 = sshll.u32 %s203_s11, 4  ;;  %s223_s30 = int_to_ptr.vmem [resolvable:$true] %s222_s30 }
  0x4c   : > { %s214_s10 = sld [smem:[%s880_s27]]   ;;  %s1188_s7 = smov 256  }
  0x4d   : > { %882 = sst [smem:[#allocation11 + $0x1]] (%p1596_p4), %s1188_s7  ;;  %s1189_s20 = smov 2  }
  0x4e   : > { %s209_s5 = scalar_lea.hbm %s1597_s1, %s827_s9  ;;  %883 = sst [smem:[#allocation11 + $0x2]] (%p1596_p4), %s1189_s20 }
  0x4f   : > { %s1190_s0 = smov 128   ;;  %s1191_s28 = smov 8  }
  0x50   : > { %884 = sst [smem:[#allocation11 + $0x3]] (%p1596_p4), %s1190_s0  ;;  %s1403_s15 = scalar_lea.sflag [#allocation7], %s199_s18 }
  0x51   : > { %885 = sst [smem:[#allocation11 + $0x4]] (%p1596_p4), %s1190_s0  ;;  %s1192_s29 = smov [#allocation10]  }
  0x52   : > { %s801_s6 = sshll.u32 %s214_s10, 26  ;;  %886 = sst [smem:[#allocation11 + $0x5]] (%p1596_p4), %s1191_s28 }
  0x53   : > { %s802_s27 = sadd.s32 134217728, %s801_s6  ;;  %s803_s11 = sshll.u32 %s201_s24, 4 }
  0x54   : > { %887 = dma.general (%p1596_p4), %s209_s5, 768, %s223_s30, %s1403_s15, %s1192_s29, [#allocation11], %s802_s27, 0  }
  0x55   : > { %s1411_s1 = scalar_lea.hbm %s1564_s2, %s827_s9  ;;  %s249_s0 = scalar_lea.vmem [#allocation8], %s803_s11 }
  0x56   : > { %s256_s10 = sshll.u32 %s249_s0, 4  ;;  %s1030_s18 = scalar_lea.hbm %s1411_s1, 256  ;;  %s1413_s10 = int_to_ptr.vmem [resolvable:$true] %s256_s10 }
  0x57   : > { %p1031_p3 = scmp.ne.s32.totalorder %s1411_s1, %s1030_s18  ;;  %s1034_s30 = scalar_lea.hbm %s1564_s2, 1024 }
  0x58   : > { %p1035_p13 = scmp.lt.u32.totalorder %s1411_s1, %s1564_s2  ;;  %p1036_p10 = scmp.lt.u32.totalorder %s1034_s30, %s1030_s18 }
  0x59   : > { %p1032_p7 = pnand %p1031_p3, %p1596_p4  ;;  %p1038_p11 = scmp.lt.u32.totalorder %s1030_s18, %s1411_s1 }
  0x5a   : > { %p1037_p9 = por %p1036_p10, %p1035_p13 }
  0x5b   : > { %p1033_p12 = pneg %p1032_p7 }
  0x5c   : > { %p1039_p5 = por %p1038_p11, %p1037_p9 }
  0x5e   : > { %p1040_p8 = pnand %p1039_p5, %p1033_p12 }
  0x60   : > { %1043 = shalt.err (!%p1040_p8)
}
  0x61   : > { %s1044_s28 = scalar_lea.vmem %s1413_s10, 256  ;;  %s1193_s27 = smov [#allocation8]  }
  0x62   : > { %p1045_p2 = scmp.ne.s32.totalorder %s1413_s10, %s1044_s28  ;;  %s1048_s29 = sshll.u32 %s1193_s27, 4  ;;  %s1049_s29 = int_to_ptr.vmem [resolvable:$false] %s1048_s29 }
  0x63   : > { %s1050_s11 = scalar_lea.vmem %s1049_s29, 512  ;;  %p1051_p0 = scmp.lt.s32.totalorder %s1413_s10, %s1049_s29 }
  0x64   : > { %p1046_p1 = pnand %p1045_p2, %p1596_p4  ;;  %p1052_p3 = scmp.lt.s32.totalorder %s1050_s11, %s1044_s28 }
  0x66   : > { %p1047_p6 = pneg %p1046_p1  ;;  %p1053_p7 = por %p1052_p3, %p1051_p0 }
  0x68   : > { %p1054_p13 = pnand %p1053_p7, %p1047_p6 }
  0x6a   : > { %1057 = shalt.err (!%p1054_p13)
}
  0x6b   : > { %s1194_s7 = smov 128   ;;  %s1195_s20 = smov 8  }
  0x6c   : > { %888 = dma.hbm_to_vmem [thread:$0]  (%p1596_p4), %s1411_s1, 256, %s1413_s10, %s1403_s15, %s1194_s7, %s1194_s7, %s1195_s20  }
  0x6d PF: > { %p806_p12 = scmp.ge.s32.totalorder %s1184_s25, 1  ;;  %p264_p10 = scmp.lt.s32.totalorder %s1184_s25, 9 }
  0x6f   : > { %p265_p9 = pnand %p806_p12, %p264_p10 }
  0x70   : > { %s1440_s0 = sand.u32 (!%p265_p9), 1, %s1160_s19   ;;  %p1598_p11 = scmp.ne.s32.totalorder (!%p265_p9), %s1586_s8, 0 }
  0x71   : > { %268 = sbr.rel (%p265_p9) target bundleno = 1361 (0x551), region = 36  ;;  %s807_s18 = sshll.u32 (!%p265_p9), %s1440_s0, 3 }
  0x72   : > { %s271_s24 = scalar_lea.sflag (!%p265_p9), [#allocation4], %s1440_s0  ;;  %s1444_s5 = scalar_lea.vmem (!%p265_p9), [#allocation3], %s807_s18 }
  0x78   : > { %1131 = dma.done.wait (%p1598_p11), %s271_s24, 128  }
  0x79   : > { %1133 = vsyncadd (%p1598_p11), %s271_s24, 4294967168  ;;  %s279_s1 = sand.u32 1, %s1281_s26   ;;  %s281_s12 = sand.u32 1, %s1148_s16  }
  0x7a   : > { %s878_s15 = smul.u32 48, %s281_s12  ;;  %s280_s10 = scalar_lea.sflag [#allocation7], %s279_s1 }
  0x7b   : > { %p1599_p4 = scmp.ne.s32.totalorder %s1590_s13, 0 }
  0x7c   : > { %s1452_s30 = scalar_lea.vmem [#allocation6], %s878_s15 }
  0x7d   : > { %1135 = dma.done.wait (%p1599_p4), %s280_s10, 1024  }
  0x7e   : > { %1137 = vsyncadd (%p1599_p4), %s280_s10, 4294966272  ;;  %s1458_s6 = sshll.u32 %s281_s12, 4  ;;  %s1461_s8 = scalar_lea.vmem [#allocation9], %s807_s18 }
  0x7f   : > { %s292_s9 = scalar_lea.vmem [#allocation8], %s1458_s6  ;;  %p810_p5 = scmp.ne.s32.totalorder %s1168_s21, 0 }
  0x80   : > { %vm332_vm0 = vcmask (!%p810_p5), 261120   ;;  %v1196_v0 = vmov (!%p810_p5), 0.0  }
  0x81   : > { %331 = sbr.rel (%p810_p5) target bundleno = 136 (0x88), region = 52  ;;  %333 = vst.msk [vmem:[#allocation2] sm:$0xff] (!%p810_p5), %vm332_vm0, %v1196_v0 }
  0x88 PF: > { %v811_v1 = vld [vmem:[%s1452_s30 + $0x10] sm:$0xff]  ;;  %v812_v2 = vld [vmem:[%s1452_s30 + $0x18] sm:$0xff]  ;;  %vm347_vm1 = vcmask 261120   ;;  %v336_v3 = vld [vmem:[%s1452_s30] sm:$0xff]  ;;  %v1197_v4 = vmov 0.0   ;;  %vm1198_vm2 = vmmov 0  }
  0x89   : > { %847 = vmatprep.subr.bf16.mxu1 %v1197_v4  ;;  %v342_v5 = vpack.c.bf16 %v812_v2, %v811_v1  ;;  %841 = vmatprep.subr.bf16.mxu0 %v1197_v4  ;;  %v337_v6 = vld [vmem:[%s1452_s30 + $0x8] sm:$0xff]  ;;  %vm483_vm3 = vcmask 130048   ;;  %v813_v24 = vld [vmem:[%s1452_s30 + $0x20] sm:$0xff]  ;;  %vm530_vm4 = vcmask 64512   ;;  %vm547_vm5 = vcmask 1043456   ;;  %p821_p8 = scmp.ne.s32.totalorder %s1168_s21, 3 }
  0x8a   : > { %v338_v7 = vpack.c.bf16 %v337_v6, %v336_v3  ;;  %849 = vmatprep.mubr.msk.bf16.mxu1 %vm1198_vm2, %v1197_v4  ;;  %843 = vmatprep.mubr.msk.bf16.mxu0 %vm1198_vm2, %v1197_v4  ;;  %v334_v10 = vld [vmem:[%s1444_s5] sm:$0xff]  ;;  %v591_v44 = vld [vmem:[%s292_s9] sm:$0xff]  ;;  %v594_v56 = vld [vmem:[#allocation2] sm:$0xff] }
  0x8b   : > { %v395_v8 = vsel %vm347_vm1, %v342_v5, 0  ;;  %v335_v11 = vpack.c.bf16 %v334_v10, %v334_v10  ;;  %v814_v25 = vld [vmem:[%s1452_s30 + $0x28] sm:$0xff] }
  0x8c   : > { %848 = vmatpush3.bf16.xpose.msra.mxu1 %v395_v8  ;;  %v352_v9 = vsel %vm347_vm1, %v338_v7, 0  ;;  %v346_v26 = vpack.c.bf16 %v814_v25, %v813_v24  ;;  %v592_v45 = vld [vmem:[%s292_s9 + $0x8] sm:$0xff] }
  0x8d   : > { %842 = vmatpush3.bf16.xpose.msra.mxu0 %v352_v9  ;;  %859 = vmatprep.subr.bf16.mxu1 %v1197_v4  ;;  %v593_v46 = vpack.c.bf16 %v592_v45, %v591_v44  ;;  %v822_v63 = vld [vmem:[%s1565_s3] ss:$0 sm:$0xff] (!%p821_p8) }
  0x8e   : > { %853 = vmatprep.subr.bf16.mxu0 %v1197_v4  ;;  %v438_v27 = vsel %vm347_vm1, %v346_v26, 0 }
  0x93   : > { %850 = vmatmul.mubr.msk.bf16.vlgmr.msra.gmra.mrb[0].mxu1 %vm347_vm1, %v335_v11 }
  0x94   : > { %844 = vmatmul.mubr.msk.bf16.vlgmr.msra.gmra.mrb[0].mxu0 %vm347_vm1, %v335_v11  ;;  %861 = vmatprep.mubr.msk.bf16.mxu1 %vm1198_vm2, %v1197_v4 }
  0x95   : > { %855 = vmatprep.mubr.msk.bf16.mxu0 %vm1198_vm2, %v1197_v4  ;;  %854 = vmatpush3.bf16.xpose.msra.mxu0 %v438_v27 }
  0x96   : > { %865 = vmatprep.subr.bf16.mxu0 %v1197_v4 }
  0x9c   : > { %856 = vmatmul.mubr.msk.bf16.vlgmr.msra.gmra.mrb[4].mxu0 %vm347_vm1, %v335_v11 }
  0x9d   : > { %867 = vmatprep.mubr.msk.bf16.mxu0 %vm1198_vm2, %v1197_v4 }
 0x166   : > { %v431_v12 = vpop.f32.mrb[0].mxu1 }
 0x167   : > { %v482_v13 = vpack.c.bf16 %v431_v12, %v431_v12  ;;  %v851_v14 = vpop.f32.mrb[1].mxu1  ;;  %v388_v15 = vpop.f32.mrb[0].mxu0 }
 0x168   : > { %v434_v16 = vpop.f32.mrb[2].mxu1  ;;  %v845_v17 = vpop.f32.mrb[1].mxu0  ;;  %v480_v20 = vmul.f32 0.25, %v388_v15 }
 0x169   : > { %v488_v18 = vsel %vm483_vm3, %v482_v13, 0  ;;  %v852_v19 = vpop.f32.mrb[3].mxu1  ;;  %v391_v21 = vpop.f32.mrb[2].mxu0 }
 0x16a   : > { %860 = vmatpush3.bf16.xpose.msra.mxu1 %v488_v18  ;;  %v846_v22 = vpop.f32.mrb[3].mxu0  ;;  %v481_v23 = vpack.c.bf16 %v480_v20, %v480_v20 }
 0x16b   : > { %871 = vmatprep.subr.bf16.mxu1 %v1197_v4 }
 0x16f   : > { %v474_v38 = vpop.f32.mrb[4].mxu0 }
 0x170   : > { %v857_v39 = vpop.f32.mrb[5].mxu0  ;;  %v543_v42 = vpack.c.bf16 %v474_v38, %v474_v38 }
 0x171   : > { %862 = vmatmul.mubr.msk.bf16.vlgmr.msra.gmra.mrb[4].mxu1 %vm483_vm3, %v481_v23  ;;  %v477_v40 = vpop.f32.mrb[6].mxu0 }
 0x172   : > { %873 = vmatprep.mubr.msk.bf16.mxu1 %vm1198_vm2, %v1197_v4  ;;  %v858_v41 = vpop.f32.mrb[7].mxu0  ;;  %v549_v43 = vsel %vm547_vm5, %v543_v42, 0  ;;  %872 = vmatpush3.bf16.msra.mxu1 %v593_v46 }
 0x173   : > { %866 = vmatpush3.bf16.msra.mxu0 %v549_v43 }
 0x244   : > { %v524_v28 = vpop.f32.mrb[4].mxu1 }
 0x245   : > { %v863_v29 = vpop.f32.mrb[5].mxu1  ;;  %v531_v30 = vsel %vm530_vm4, %v524_v28, -inf }
 0x246   : > { %532 = vmax.xlane.f32.xlu0 %v531_v30  ;;  %v527_v31 = vpop.f32.mrb[6].mxu1 }
 0x247   : > { %v864_v32 = vpop.f32.mrb[7].mxu1 }
 0x2d3   : > { %v533_v33 = vpop.xlane.xlu0 %532 }
 0x2d4   : > { %v534_v34 = vsub.f32 %v524_v28, %v533_v33 }
 0x2d6   : > { %v535_v35 = vmul.f32 1.442695, %v534_v34 }
 0x2d8   : > { %998 = vpow2.f32 %v535_v35 }
 0x2e2   : > { %v999_v36 = vpop.eup %998 }
 0x2e3   : > { %v537_v37 = vsel %vm530_vm4, %v999_v36, 0.0 }
 0x2e4   : > { %538 = vadd.xlane.f32.xlu0 %v537_v37 }
 0x371   : > { %v539_v47 = vpop.xlane.xlu0 %538 }
 0x372   : > { %1000 = vrcp.f32 %v539_v47 }
 0x37c   : > { %v1001_v48 = vpop.eup %1000 }
 0x37d   : > { %v541_v49 = vmul.f32 %v1001_v48, %v999_v36 }
 0x37f   : > { %v542_v50 = vpack.c.bf16 %v541_v49, %v541_v49 }
 0x381   : > { %868 = vmatmul.mubr.msk.bf16.vlgmr.msra.gmra.mrb[8].mxu0 %vm530_vm4, %v542_v50 }
 0x454   : > { %v585_v51 = vpop.f32.mrb[8].mxu0 }
 0x455   : > { %v595_v52 = vpack.c.bf16 %v585_v51, %v585_v51  ;;  %v869_v53 = vpop.f32.mrb[9].mxu0 }
 0x456   : > { %v588_v54 = vpop.f32.mrb[10].mxu0 }
 0x457   : > { %v870_v55 = vpop.f32.mrb[11].mxu0  ;;  %874 = vmatmul.mubr.msk.bf16.vlgmr.msra.gmra.mrb[8].mxu1 %vm483_vm3, %v595_v52 }
 0x527   : > { %644 = sbr.rel (%p821_p8) target bundleno = 1336 (0x538), region = 56 }
 0x52a   : > { %v633_v57 = vpop.f32.mrb[8].mxu1 }
 0x52b   : > { %v639_v58 = vadd.f32 %v633_v57, %v594_v56  ;;  %v875_v59 = vpop.f32.mrb[9].mxu1 }
 0x52c   : > { %v636_v60 = vpop.f32.mrb[10].mxu1 }
 0x52d   : > { %640 = vst.msk [vmem:[#allocation2] sm:$0xff] %vm347_vm1, %v639_v58  ;;  %v876_v61 = vpop.f32.mrb[11].mxu1 }
 0x534   : > { %v645_v62 = vld [vmem:[#allocation2] sm:$0xff] }
 0x535   : > { %v653_v0 = vadd.f32 %v822_v63, %v645_v62 }
 0x537   : > { %654 = vst.msk [vmem:[%s1461_s8] sm:$0xff] %vm347_vm1, %v653_v0 }
 0x538 PF: > { %s824_s28 = sshll.u32 %s1172_s22, 7  ;;  %s669_s11 = sshll.u32 %s1461_s8, 4  ;;  %s670_s11 = int_to_ptr.vmem [resolvable:$true] %s669_s11 }
 0x539   : > { %s1504_s21 = scalar_lea.hbm %s1566_s4, %s824_s28  ;;  %s656_s7 = scalar_lea.sflag [#allocation5], %s1440_s0 }
 0x53a   : > { %s1058_s20 = scalar_lea.vmem %s670_s11, 128  ;;  %p1600_p1 = scmp.ne.s32.totalorder %s1591_s14, 0 }
 0x53b   : > { %p1059_p2 = scmp.ne.s32.totalorder %s670_s11, %s1058_s20  ;;  %s1199_s18 = smov [#allocation9]  }
 0x53c   : > { %s1062_s24 = sshll.u32 %s1199_s18, 4  ;;  %s1063_s24 = int_to_ptr.vmem [resolvable:$false] %s1062_s24 }
 0x53d   : > { %p1060_p6 = pnand %p1059_p2, %p1600_p1  ;;  %s1064_s5 = scalar_lea.vmem %s1063_s24, 256 }
 0x53e   : > { %p1065_p3 = scmp.lt.s32.totalorder %s670_s11, %s1063_s24  ;;  %p1066_p7 = scmp.lt.s32.totalorder %s1064_s5, %s1058_s20 }
 0x53f   : > { %p1061_p0 = pneg %p1060_p6 }
 0x540   : > { %p1067_p13 = por %p1066_p7, %p1065_p3 }
 0x542   : > { %p1068_p12 = pnand %p1067_p13, %p1061_p0 }
 0x544   : > { %1071 = shalt.err (!%p1068_p12)
}
 0x545   : > { %s1072_s22 = scalar_lea.hbm %s1504_s21, 128  ;;  %s1076_s12 = scalar_lea.hbm %s1566_s4, 256 }
 0x546   : > { %p1073_p10 = scmp.ne.s32.totalorder %s1504_s21, %s1072_s22  ;;  %p1077_p4 = scmp.lt.u32.totalorder %s1504_s21, %s1566_s4 }
 0x547   : > { %p1078_p5 = scmp.lt.u32.totalorder %s1076_s12, %s1072_s22  ;;  %p1080_p2 = scmp.lt.u32.totalorder %s1072_s22, %s1504_s21 }
 0x548   : > { %p1074_p9 = pnand %p1073_p10, %p1600_p1 }
 0x549   : > { %p1079_p8 = por %p1078_p5, %p1077_p4 }
 0x54a   : > { %p1075_p11 = pneg %p1074_p9 }
 0x54b   : > { %p1081_p6 = por %p1080_p2, %p1079_p8 }
 0x54d   : > { %p1082_p0 = pnand %p1081_p6, %p1075_p11 }
 0x54f   : > { %1085 = shalt.err (!%p1082_p0)
}
 0x550   : > { %892 = dma.vmem_to_hbm [thread:$0]  (%p1600_p1), %s670_s11, 128, %s1504_s21, %s656_s7  }
 0x551 PF: > { %s1601_s30 = sld [smem:[#allocation16_spill]]  ;;  %s1602_s6 = sld [smem:[#allocation23_spill]] }
 0x552   : > { %p898_p3 = scmp.ge.s32.totalorder %s1184_s25, 2 }
 0x557   : > { %s681_s9 = sand.u32 1, %s1601_s30   ;;  %p1603_p7 = scmp.ne.s32.totalorder %s1602_s6, 0 }
 0x558   : > { %s682_s8 = scalar_lea.sflag [#allocation5], %s681_s9 }
 0x559   : > { %p895_p13 = pnand %p898_p3, %p1603_p7 }
 0x55b   : > { %1139 = dma.done.wait (!%p895_p13), %s682_s8, 128  }
 0x55c   : > { %1141 = vsyncadd (!%p895_p13), %s682_s8, 4294967168  ;;  %s23_s25 = sadd.s32 1, %s1184_s25   ;;  %s1604_s26 = sld [smem:[#allocation21_spill]] }
 0x55d   : > { %p20_p12 = scmp.ge.s32.totalorder %s23_s25, 10   ;;  %s1605_s14 = sld [smem:[#allocation17_spill]] }
 0x55e   : > { %s1606_s20 = sld [smem:[#allocation22_spill]]  ;;  %s1607_s22 = sld [smem:[#allocation18_spill]] }
 0x55f   : > { %s1608_s13 = sld [smem:[#allocation19_spill]]  ;;  %s1609_s24 = sld [smem:[#allocation20_spill]] }
 0x560   : > { %s1610_s15 = smov %s1148_s16  ;;  %s1611_s16 = smov %s1152_s17 }
 0x561   : > { %s1613_s18 = smov %s1160_s19  ;;  %s1615_s21 = smov %s1176_s23 }
 0x562   : > { %s1612_s17 = smov %s1604_s26  ;;  %22 = sbr.rel (!%p20_p12) target bundleno = 14 (0xe), region = 120 }
 0x563   : > { %s1614_s19 = smov %s1605_s14 }
 0x565   : > { %s1616_s23 = smov %s1608_s13 }
 0x569   :  { %687 = vsyncpa [#allocation4], 1 }
 0x56a   :  { %689 = vsyncpa [#allocation4 + $0x1], 1 }
 0x56b   :  { %690 = vsyncpa [#allocation7], 1 }
 0x56c   :  { %692 = vsyncpa [#allocation7 + $0x1], 1 }
 0x56d   :  { %693 = vsyncpa [#allocation5], 1 }
 0x56e   :  { %695 = vsyncpa [#allocation5 + $0x1], 1 }

</bundles_post_ra>
